<compile_context>
chip_gen: v5e
topology: v5e:2x2
jax: 0.10.0
libtpu: 0.0.40
codegen_flags: <defaults>
</compile_context>

<pallas_src>
import jax
import jax.numpy as jnp
import numpy as np
from jax import lax
from jax.experimental import pallas as pl
from jax.experimental.pallas import tpu as pltpu


def _masked_rand_kernel(seed_ref, mask_ref, out_ref):
    tb, tg = out_ref.shape
    i = pl.program_id(0)

    # Global element indices for this tile (counter-based PRNG: no shared
    # state, so different tiles / cores automatically get distinct streams).
    row = lax.broadcasted_iota(jnp.int32, (tb, tg), 0) + i * tb
    col = lax.broadcasted_iota(jnp.int32, (tb, tg), 1)
    flat = (row * tg + col).astype(jnp.uint32)

    seed = seed_ref[0].astype(jnp.uint32)
    x = flat + seed * jnp.uint32(0x9E3779B9)

    # murmur3 fmix32 finalizer -> well-mixed 32 random bits per element.
    x = x ^ (x >> 16)
    x = x * jnp.uint32(0x85EBCA6B)
    x = x ^ (x >> 13)
    x = x * jnp.uint32(0xC2B2AE35)
    x = x ^ (x >> 16)

    # Uniform [0,1): put the top 23 random bits into the mantissa of a float
    # in [1,2) and subtract 1 (no int->float convert needed).
    fbits = (x >> 9) | jnp.uint32(0x3F800000)
    uniform = lax.bitcast_convert_type(fbits, jnp.float32) - 1.0

    keep = mask_ref[...] != 0
    out_ref[...] = jnp.where(keep, uniform, -jnp.inf)


def baseline_forward(input_ids, attention_mask, group_id, member_mask, *,
                     seed=0, block_b=512):
    """Pallas implementation of BaselineModel.forward.

    Returns float32 logits with member_mask's shape: uniform [0,1) where
    member_mask is True, -inf where it is False.
    """
    del input_ids, attention_mask, group_id  # unused, as in the PyTorch module

    B, G = member_mask.shape
    mask_i8 = member_mask.astype(jnp.int8)           # 1 B/elem DMA, not 4 B
    seed_arr = jnp.asarray([seed], dtype=jnp.int32)

    # Tile over the batch axis; full last (lane) dim per block.
    # tb == B (full dim) for small B, otherwise a multiple of 8.
    tb = B if B <= block_b else block_b
    grid = (pl.cdiv(B, tb),)

    out = pl.pallas_call(
        _masked_rand_kernel,
        out_shape=jax.ShapeDtypeStruct((B, G), jnp.float32),
        grid=grid,
        in_specs=[
            pl.BlockSpec(memory_space=pltpu.MemorySpace.SMEM),   # seed scalar
            pl.BlockSpec((tb, G), lambda i: (i, 0)),             # mask tile
        ],
        out_specs=pl.BlockSpec((tb, G), lambda i: (i, 0)),
        compiler_params=pltpu.CompilerParams(
            dimension_semantics=("parallel",),   # shard batch tiles across TCs (v7x)
        ),
    )(seed_arr, mask_i8)
    return out


if __name__ == "__main__":
    key = jax.random.PRNGKey(0)
    k1, k2 = jax.random.split(key)

    B, S, G = 16, 8, 128  # batch, sequence length, group members (lane-aligned)

    input_ids = jax.random.randint(k1, (B, S), 0, 1000, dtype=jnp.int32)
    attention_mask = jnp.ones((B, S), dtype=jnp.int32)
    group_id = jnp.arange(B, dtype=jnp.int32)
    member_mask = jax.random.bernoulli(k2, p=0.5, shape=(B, G))

    # block_b=8 so the small demo still exercises a multi-step grid (grid=(2,)).
    logits = baseline_forward(input_ids, attention_mask, group_id, member_mask,
                              seed=0, block_b=8)
    logits = jax.block_until_ready(logits)

    # Sanity checks: masked-out positions are -inf, kept positions are in [0, 1).
    mask_np = np.asarray(jax.device_get(member_mask))
    out_np = np.asarray(jax.device_get(logits))
    assert out_np.shape == mask_np.shape
    assert out_np.dtype == np.float32
    masked_out = out_np[~mask_np]
    kept = out_np[mask_np]
    assert masked_out.size == 0 or np.all(np.isneginf(masked_out))
    assert kept.size == 0 or (np.all(kept >= 0.0) and np.all(kept < 1.0))

    print("KERNEL_OK")
</pallas_src>

<mosaic_0001>
module attributes {stable_mosaic.version = 11 : i64} {
  func.func @_masked_rand_kernel(%arg0: i32, %arg1: memref<1xi32, #tpu.memory_space<smem>>, %arg2: memref<8x128xi8, #tpu.memory_space<vmem>>, %arg3: memref<8x128xf32, #tpu.memory_space<vmem>>) attributes {dimension_semantics = [#tpu.dimension_semantics<parallel>], iteration_bounds = array<i64: 2>, scalar_prefetch = 0 : i64, scratch_operands = 0 : i64, tpu.core_type = #tpu.core_type<tc>, window_params = [{transform_indices = @transform_0, window_bounds = array<i64: 1>}, {transform_indices = @transform_1, window_bounds = array<i64: 8, 128>}, {transform_indices = @transform_2, window_bounds = array<i64: 8, 128>}]} {
    %0 = tpu.iota {dimensions = array<i32: 0>} : vector<8x128xi32>
    %c8_i32 = arith.constant 8 : i32
    %1 = arith.muli %arg0, %c8_i32 : i32
    %2 = vector.broadcast %1 : i32 to vector<8x128xi32>
    %3 = arith.addi %0, %2 : vector<8x128xi32>
    %4 = tpu.iota {dimensions = array<i32: 1>} : vector<8x128xi32>
    %c128_i32 = arith.constant 128 : i32
    %5 = vector.broadcast %c128_i32 : i32 to vector<8x128xi32>
    %6 = arith.muli %3, %5 : vector<8x128xi32>
    %7 = arith.addi %6, %4 : vector<8x128xi32>
    %c0 = arith.constant 0 : index
    %8 = memref.load %arg1[%c0] : memref<1xi32, #tpu.memory_space<smem>>
    %c-1640531527_i32 = arith.constant -1640531527 : i32
    %9 = arith.muli %8, %c-1640531527_i32 : i32
    %10 = vector.broadcast %9 : i32 to vector<8x128xi32>
    %11 = arith.addi %7, %10 : vector<8x128xi32>
    %c16_i32 = arith.constant 16 : i32
    %12 = vector.broadcast %c16_i32 : i32 to vector<8x128xi32>
    %13 = arith.shrui %11, %12 : vector<8x128xi32>
    %14 = arith.xori %11, %13 : vector<8x128xi32>
    %c-2048144789_i32 = arith.constant -2048144789 : i32
    %15 = vector.broadcast %c-2048144789_i32 : i32 to vector<8x128xi32>
    %16 = arith.muli %14, %15 : vector<8x128xi32>
    %c13_i32 = arith.constant 13 : i32
    %17 = vector.broadcast %c13_i32 : i32 to vector<8x128xi32>
    %18 = arith.shrui %16, %17 : vector<8x128xi32>
    %19 = arith.xori %16, %18 : vector<8x128xi32>
    %c-1028477387_i32 = arith.constant -1028477387 : i32
    %20 = vector.broadcast %c-1028477387_i32 : i32 to vector<8x128xi32>
    %21 = arith.muli %19, %20 : vector<8x128xi32>
    %c16_i32_0 = arith.constant 16 : i32
    %22 = vector.broadcast %c16_i32_0 : i32 to vector<8x128xi32>
    %23 = arith.shrui %21, %22 : vector<8x128xi32>
    %24 = arith.xori %21, %23 : vector<8x128xi32>
    %c9_i32 = arith.constant 9 : i32
    %25 = vector.broadcast %c9_i32 : i32 to vector<8x128xi32>
    %26 = arith.shrui %24, %25 : vector<8x128xi32>
    %c1065353216_i32 = arith.constant 1065353216 : i32
    %27 = vector.broadcast %c1065353216_i32 : i32 to vector<8x128xi32>
    %28 = arith.ori %26, %27 : vector<8x128xi32>
    %29 = tpu.bitcast %28 : vector<8x128xi32> -> vector<8x128xf32>
    %cst = arith.constant 1.000000e+00 : f32
    %30 = vector.broadcast %cst : f32 to vector<8x128xf32>
    %31 = arith.subf %29, %30 : vector<8x128xf32>
    %c0_1 = arith.constant 0 : index
    %c0_2 = arith.constant 0 : index
    %32 = vector.load %arg2[%c0_1, %c0_2] : memref<8x128xi8, #tpu.memory_space<vmem>>, vector<8x128xi8>
    %c0_i8 = arith.constant 0 : i8
    %33 = vector.broadcast %c0_i8 : i8 to vector<8x128xi8>
    %34 = arith.cmpi ne, %32, %33 : vector<8x128xi8>
    %cst_3 = arith.constant 0xFF800000 : f32
    %35 = vector.broadcast %cst_3 : f32 to vector<8x128xf32>
    %36 = arith.select %34, %31, %35 : vector<8x128xi1>, vector<8x128xf32>
    %c0_4 = arith.constant 0 : index
    %c0_5 = arith.constant 0 : index
    %37 = vector.load %arg3[%c0_4, %c0_5] : memref<8x128xf32, #tpu.memory_space<vmem>>, vector<8x128xf32>
    tpu.vector_store %arg3[%c0_4, %c0_5], %36 {strides = array<i32>} : memref<8x128xf32, #tpu.memory_space<vmem>>, vector<8x128xf32>,
    return
  }
  func.func @transform_0(%arg0: i32) -> i32 {
    %c0_i32 = arith.constant 0 : i32
    %c0_i32_0 = arith.constant 0 : i32
    return %c0_i32 : i32
  }
  func.func @transform_1(%arg0: i32) -> (i32, i32) {
    %c0_i32 = arith.constant 0 : i32
    %c0_i32_0 = arith.constant 0 : i32
    return %arg0, %c0_i32 : i32, i32
  }
  func.func @transform_2(%arg0: i32) -> (i32, i32) {
    %c0_i32 = arith.constant 0 : i32
    %c0_i32_0 = arith.constant 0 : i32
    return %arg0, %c0_i32 : i32, i32
  }
}

</mosaic_0001>

<bundles_post_ra>
// kernel: tpu_custom_call.1
= control target key start
LH: loop header
LB: loop body
LE: loop exit
PB: predicated region body
PF: predicated region fallthrough
CT: control target
= control target key end

     0   :  { %s588_s0 = inlined_call_operand.<no memory space> [shape: s32[1], index: 0, kind: input, shape index: {}]   ;;  %s589_s1 = inlined_call_operand.hbm [shape: s8[16,128], index: 1, kind: input, shape index: {}]   ;;  %s590_s2 = inlined_call_operand.hbm [shape: f32[16,128], index: 2, kind: output, shape index: {}]  }
   0x1   :  { %7 = sst [smem:[#allocation2]] %s588_s0 }
   0x2   :  { %8 = vsyncpa [#allocation4], 0 }
   0x3   :  { %10 = vsyncpa [#allocation4 + $0x1], 0 }
   0x4   :  { %11 = vsyncpa [#allocation5], 0 }
   0x5   :  { %13 = vsyncpa [#allocation5 + $0x1], 0  ;;  %s460_s11 = smov 0   ;;  %s462_s12 = smov 0  }
   0x6   :  { %s464_s13 = smov 0   ;;  %s466_s14 = smov 0  }
   0x7 LB: > { %s481_s0 = sadd.s32 4294967295, %s439_s14   ;;  %s282_s15 = sadd.s32 4294967294, %s439_s14   ;;  %s439_s14 = sphi %s466_s14, %s600_s14   ;;  %s435_s13 = sphi %s464_s13, %s599_s13   ;;  %s431_s12 = sphi %s462_s12, %s598_s12   ;;  %s427_s11 = sphi %s460_s11, %s597_s11  }
   0x8   : > { %s485_s16 = sadd.s32 1, %s439_s14   ;;  %s47_s17 = sadd.s32 1, %s435_s13 }
   0x9   : > { %s44_s18 = ssub.s32 %s439_s14, %s485_s16  ;;  %p54_p0 = scmp.ne.s32.totalorder %s435_s13, %s431_s12 }
   0xa   : > { %p45_p1 = scmp.eq.s32.totalorder %s44_s18, 0  ;;  %p55_p2 = scmp.eq.s32.totalorder %s439_s14, 0 }
   0xb   : > { %p60_p3 = scmp.ne.s32.totalorder %s431_s12, %s427_s11  ;;  %p61_p4 = scmp.eq.s32.totalorder %s481_s0, 0 }
   0xc   : > { %s497_s19 = scalar_select %p45_p1, %s435_s13, %s47_s17  }
   0xd   : > { %p499_p5 = por %p55_p2, %p54_p0  ;;  %p503_p6 = por %p61_p4, %p60_p3 }
   0xe   : > { %p84_p7 = scmp.eq.s32.totalorder %s481_s0, 1  ;;  %p90_p8 = scmp.eq.s32.totalorder %s282_s15, 1 }
   0xf   : > { %p308_p10 = scmp.lt.s32.totalorder %s439_s14, 2  ;;  %s113_s24 = sand.u32 1, %s435_s13  }
  0x10   : > { %p510_p11 = por %p84_p7, %p54_p0  ;;  %p514_p12 = por %p90_p8, %p60_p3 }
  0x11   : > { %s286_s25 = sshll.u32 %s439_s14, 1  ;;  %s285_s26 = sshll.u32 %s113_s24, 1 }
  0x12   : > { %s121_s29 = scalar_lea.hbm %s589_s1, %s286_s25  ;;  %s117_s3 = scalar_lea.vmem [#allocation3], %s285_s26 }
  0x13   : > { %s123_s30 = sshll.u32 %s121_s29, 4  ;;  %s125_s4 = sshll.u32 %s117_s3, 4  ;;  %s124_s30 = int_to_ptr.hbm [resolvable:$true] %s123_s30  ;;  %s126_s4 = int_to_ptr.vmem [resolvable:$true] %s125_s4 }
  0x14   : > { %p525_p13 = pnand %p308_p10, %p499_p5  ;;  %p287_p0 = scmp.ge.s32.totalorder %s439_s14, 1 }
  0x15   : > { %p130_p1 = scmp.lt.s32.totalorder %s439_s14, 3  ;;  %s114_s6 = scalar_lea.sflag [#allocation4], %s113_s24 }
  0x16   : > { %s343_s7 = sshra.s32 %s124_s30, 4  ;;  %p347_p3 = pneg %p525_p13  ;;  %s344_s7 = int_to_ptr.hbm [resolvable:$true] %s343_s7 }
  0x17   : > { %s345_s8 = scalar_lea.hbm %s344_s7, 2  ;;  %s350_s15 = scalar_lea.hbm %s589_s1, 4 }
  0x18   : > { %p346_p2 = scmp.ne.s32.totalorder %s344_s7, %s345_s8  ;;  %p351_p5 = scmp.lt.s32.totalorder %s344_s7, %s589_s1 }
  0x19   : > { %p352_p8 = scmp.lt.s32.totalorder %s350_s15, %s345_s8 }
  0x1a   : > { %p348_p4 = pnand %p347_p3, %p346_p2 }
  0x1b   : > { %p353_p10 = por %p352_p8, %p351_p5 }
  0x1c   : > { %p349_p7 = pneg %p348_p4 }
  0x1e   : > { %p354_p9 = pnand %p353_p10, %p349_p7 }
  0x20   : > { %357 = shalt.err (!%p354_p9)
}
  0x21   : > { %303 = dma.hbm_to_vmem [thread:$0]  (!%p525_p13), %s124_s30, 32, %s126_s4, %s114_s6  }
  0x22   : > { %p131_p2 = pnand %p287_p0, %p130_p1 }
  0x23   : > { %s546_s20 = sand.u32 (!%p131_p2), 1, %s431_s12  }
  0x24   : > { %134 = sbr.rel (%p131_p2) target bundleno = 80 (0x50), region = 28  ;;  %s288_s24 = sshll.u32 (!%p131_p2), %s546_s20, 1 }
  0x25   : > { %s137_s25 = scalar_lea.sflag (!%p131_p2), [#allocation4], %s546_s20  ;;  %s140_s26 = scalar_lea.vmem (!%p131_p2), [#allocation3], %s288_s24 }
  0x29   : > { %418 = dma.done.wait (%p503_p6), %s137_s25, 32  }
  0x2a   : > { %420 = vsyncadd (%p503_p6), %s137_s25, 4294967264  ;;  %v164_v0 = vlaneseq  ;;  %s290_s27 = sshll.u32 %s481_s0, 3  ;;  %s173_s28 = sld [smem:[#allocation2]]  ;;  %v189_v13 = vld [vmem:[%s140_s26] sm:$0x3]  ;;  %v441_v17 = vmov 0  }
  0x2b   : > { %v167_v1 = vstv %s290_s27  ;;  %vm190_vm0 = vnez %v189_v13  ;;  %s289_s0 = sshll.u32 %s546_s20, 3  ;;  %s207_s3 = scalar_lea.hbm %s590_s2, %s290_s27 }
  0x2c   : > { %v165_v2 = vshrl.u32 %v164_v0, 7  ;;  %v170_v4 = vand.u32 127, %v164_v0  ;;  %v191_v18 = vsel %vm190_vm0, 16843009, %v441_v17  ;;  %s161_s4 = scalar_lea.vmem [#allocation6], %s289_s0  ;;  %s211_s6 = sshll.u32 %s207_s3, 4  ;;  %s212_s6 = int_to_ptr.hbm [resolvable:$true] %s211_s6 }
  0x2d   : > { %v192_v20 = vunpack.c.0.s8 %v191_v18  ;;  %s209_s5 = sshll.u32 %s161_s4, 4  ;;  %s197_s7 = scalar_lea.sflag [#allocation5], %s546_s20  ;;  %s210_s5 = int_to_ptr.vmem [resolvable:$true] %s209_s5 }
  0x2e   : > { %v168_v3 = vadd.s32 %v167_v1, %v165_v2  ;;  %s387_s8 = sshra.s32 %s212_s6, 4  ;;  %s393_s17 = scalar_lea.hbm %s590_s2, 16  ;;  %s388_s8 = int_to_ptr.hbm [resolvable:$true] %s387_s8 }
  0x2f   : > { %vm193_vm1 = vcmp.ne.s32.totalorder %v192_v20, 0  ;;  %s389_s9 = scalar_lea.hbm %s388_s8, 8  ;;  %p394_p0 = scmp.lt.s32.totalorder %s388_s8, %s590_s2 }
  0x30   : > { %v171_v5 = vmul.u32 128, %v168_v3  ;;  %s174_s29 = smul.u32 2654435769, %s173_s28  ;;  %p390_p6 = scmp.ne.s32.totalorder %s388_s8, %s389_s9 }
  0x31   : > { %p395_p1 = scmp.lt.s32.totalorder %s393_s17, %s389_s9 }
  0x32   : > { %v172_v6 = vadd.s32 %v171_v5, %v170_v4  ;;  %v175_v7 = vstv %s174_s29  ;;  %p391_p9 = pnand %p390_p6, %p510_p11 }
  0x33   : > { %p396_p3 = por %p395_p1, %p394_p0 }
  0x34   : > { %v176_v8 = vadd.s32 %v175_v7, %v172_v6  ;;  %p392_p13 = pneg %p391_p9 }
  0x36   : > { %v177_v9 = vshrl.u32 %v176_v8, 16  ;;  %p397_p4 = pnand %p396_p3, %p392_p13 }
  0x38   : > { %v178_v10 = vxor.u32 %v177_v9, %v176_v8 }
  0x3a   : > { %v179_v11 = vmul.u32 2246822507, %v178_v10 }
  0x3c   : > { %v180_v12 = vshrl.u32 %v179_v11, 13 }
  0x3e   : > { %v181_v14 = vxor.u32 %v180_v12, %v179_v11 }
  0x40   : > { %v182_v15 = vmul.u32 3266489909, %v181_v14 }
  0x42   : > { %v183_v16 = vshrl.u32 %v182_v15, 16 }
  0x44   : > { %v184_v19 = vxor.u32 %v183_v16, %v182_v15 }
  0x46   : > { %v185_v21 = vshrl.u32 %v184_v19, 9 }
  0x48   : > { %v186_v22 = vor.u32 1065353216, %v185_v21 }
  0x4a   : > { %v291_v23 = vadd.f32 -1.0, %v186_v22 }
  0x4c   : > { %v194_v24 = vsel %vm193_vm1, %v291_v23, -inf }
  0x4d   : > { %195 = vst [vmem:[%s161_s4] sm:$0xff] %v194_v24 }
  0x4e   : > { %400 = shalt.err (!%p397_p4)
}
  0x4f   : > { %298 = dma.vmem_to_hbm [thread:$0]  (%p510_p11), %s210_s5, 128, %s212_s6, %s197_s7  }
  0x50 PF: > { %s223_s20 = sand.u32 1, %s427_s11   ;;  %p596_p7 = scmp.ge.s32.totalorder %s439_s14, 2 }
  0x51   : > { %s224_s25 = scalar_lea.sflag [#allocation5], %s223_s20 }
  0x52   : > { %p305_p5 = pnand %p596_p7, %p514_p12 }
  0x54   : > { %p306_p8 = pneg %p305_p5 }
  0x56   : > { %422 = dma.done.wait (%p306_p8), %s224_s25, 128  }
  0x57   : > { %424 = vsyncadd (%p306_p8), %s224_s25, 4294967168  ;;  %p16_p10 = scmp.ge.s32.totalorder %s485_s16, 4   ;;  %s597_s11 = smov %s431_s12 }
  0x58   : > { %s598_s12 = smov %s435_s13  ;;  %s599_s13 = smov %s497_s19 }
  0x59   : > { %s600_s14 = smov %s485_s16  ;;  %18 = sbr.rel (!%p16_p10) target bundleno = 7 (0x7), region = 73 }
  0x5e   :  { %230 = vsyncpa [#allocation4], 1 }
  0x5f   :  { %232 = vsyncpa [#allocation4 + $0x1], 1 }
  0x60   :  { %233 = vsyncpa [#allocation5], 1 }
  0x61   :  { %235 = vsyncpa [#allocation5 + $0x1], 1 }

</bundles_post_ra>
